<compile_context>
chip_gen: v6e
topology: v6e:2x2x1
jax: 0.10.0
libtpu: 0.0.40
codegen_flags: <defaults>
</compile_context>

<pallas_src>
import functools

import jax
import jax.numpy as jnp
from jax.experimental import pallas as pl
from jax.experimental.pallas import tpu as pltpu


def _contrastive_loss_kernel(o1_ref, o2_ref, lbl_ref, out_ref, acc_ref, *,
                             margin: float, eps: float, n_rows: int,
                             block_rows: int):
    i = pl.program_id(0)

    @pl.when(i == 0)
    def _init():
        acc_ref[...] = jnp.zeros_like(acc_ref)

    x1 = o1_ref[...].astype(jnp.float32)                  # (bn, D)
    x2 = o2_ref[...].astype(jnp.float32)                  # (bn, D)
    lbl = lbl_ref[...].astype(jnp.float32)                # (bn, 1)

    diff = x1 - x2 + jnp.float32(eps)                     # pairwise_distance eps
    d2 = jnp.sum(diff * diff, axis=1, keepdims=True)      # (bn, 1) == dist^2
    dist = jnp.sqrt(d2)
    hinge = jnp.maximum(jnp.float32(margin) - dist, jnp.float32(0.0))
    per_row = (1.0 - lbl) * d2 + lbl * (hinge * hinge)    # (bn, 1)

    # Mask rows past the true batch size (last, possibly partial, block).
    row = jax.lax.broadcasted_iota(jnp.int32, per_row.shape, 0) + i * block_rows
    per_row = jnp.where(row < n_rows, per_row, jnp.float32(0.0))

    acc_ref[...] += jnp.sum(per_row, keepdims=True)       # (1, 1) running sum

    @pl.when(i == pl.num_programs(0) - 1)
    def _finalize():
        out_ref[...] = acc_ref[...] / jnp.float32(n_rows)


def contrastive_loss(output1: jax.Array, output2: jax.Array, label: jax.Array,
                     *, margin: float = 2.0, eps: float = 1e-6,
                     block_rows: int = 512) -> jax.Array:
    """Pallas-TPU equivalent of ContrastiveLoss.forward (returns a scalar)."""
    assert output1.ndim == 2 and output1.shape == output2.shape
    n, d = output1.shape
    assert label.shape[0] == n

    label2d = label.reshape(n, 1)                 # native dtype; cast in-kernel

    # Keep each (bn, D) f32-equivalent tile around <=4 MiB so that
    # 2 inputs x 2 pipeline buffers stay well under the default scoped VMEM.
    max_rows_by_vmem = max(8, (((4 << 20) // max(1, d * 4)) // 8) * 8)
    bn = min(block_rows, max_rows_by_vmem)
    bn = max(8, (bn // 8) * 8)                    # multiple of 8 (sublane tile)
    if n <= bn:
        bn = n                                    # single block, no padding
    grid = (pl.cdiv(n, bn),)

    kernel = functools.partial(
        _contrastive_loss_kernel,
        margin=float(margin), eps=float(eps), n_rows=n, block_rows=bn)

    out = pl.pallas_call(
        kernel,
        out_shape=jax.ShapeDtypeStruct((1, 1), jnp.float32),
        grid=grid,
        in_specs=[
            pl.BlockSpec((bn, d), lambda i: (i, 0)),   # output1 tile
            pl.BlockSpec((bn, d), lambda i: (i, 0)),   # output2 tile
            pl.BlockSpec((bn, 1), lambda i: (i, 0)),   # label tile
        ],
        out_specs=pl.BlockSpec((1, 1), lambda i: (0, 0)),  # resident accumulator out
        scratch_shapes=[pltpu.VMEM((1, 1), jnp.float32)],
        compiler_params=pltpu.CompilerParams(
            dimension_semantics=("arbitrary",)),
    )(output1, output2, label2d)
    return out[0, 0]


def _contrastive_loss_ref(o1, o2, label, margin=2.0, eps=1e-6):
    """Pure-JAX reference mirroring the PyTorch module."""
    o1 = o1.astype(jnp.float32)
    o2 = o2.astype(jnp.float32)
    dist = jnp.sqrt(jnp.sum((o1 - o2 + eps) ** 2, axis=1))
    lbl = label.astype(jnp.float32)
    return jnp.mean((1.0 - lbl) * dist ** 2 +
                    lbl * jnp.maximum(margin - dist, 0.0) ** 2)


if __name__ == "__main__":
    key = jax.random.PRNGKey(0)
    k1, k2, k3, k4, k5, k6 = jax.random.split(key, 6)

    # Small case consistent with the module (batch=8, hidden=32): single block.
    N, D = 8, 32
    o1 = jax.random.normal(k1, (N, D), dtype=jnp.float32)
    o2 = jax.random.normal(k2, (N, D), dtype=jnp.float32)
    lbl = jax.random.randint(k3, (N,), 0, 2).astype(jnp.float32)

    loss = jax.block_until_ready(contrastive_loss(o1, o2, lbl))
    ref = jax.block_until_ready(_contrastive_loss_ref(o1, o2, lbl))
    assert jnp.allclose(loss, ref, rtol=1e-5, atol=1e-6), (loss, ref)

    # Larger case exercising the tiled grid + tail-row masking.
    N2, D2 = 300, 64
    o1b = jax.random.normal(k4, (N2, D2), dtype=jnp.float32)
    o2b = jax.random.normal(k5, (N2, D2), dtype=jnp.float32)
    lblb = jax.random.randint(k6, (N2,), 0, 2).astype(jnp.float32)

    loss2 = jax.block_until_ready(contrastive_loss(o1b, o2b, lblb, block_rows=128))
    ref2 = jax.block_until_ready(_contrastive_loss_ref(o1b, o2b, lblb))
    assert jnp.allclose(loss2, ref2, rtol=1e-5, atol=1e-6), (loss2, ref2)

    print("KERNEL_OK")
</pallas_src>

<mosaic_0001>
module attributes {stable_mosaic.version = 11 : i64} {
  func.func @_contrastive_loss_kernel(%arg0: i32, %arg1: memref<8x32xf32, #tpu.memory_space<vmem>>, %arg2: memref<8x32xf32, #tpu.memory_space<vmem>>, %arg3: memref<8x1xf32, #tpu.memory_space<vmem>>, %arg4: memref<1x1xf32, #tpu.memory_space<vmem>>, %arg5: memref<1x1xf32, #tpu.memory_space<vmem>>) attributes {dimension_semantics = [#tpu.dimension_semantics<arbitrary>], iteration_bounds = array<i64: 1>, scalar_prefetch = 0 : i64, scratch_operands = 1 : i64, tpu.core_type = #tpu.core_type<tc>, window_params = [{transform_indices = @transform_0, window_bounds = array<i64: 8, 32>}, {transform_indices = @transform_1, window_bounds = array<i64: 8, 32>}, {transform_indices = @transform_2, window_bounds = array<i64: 8, 1>}, {pipeline_mode = #tpu.pipeline_mode<synchronous>, transform_indices = @transform_3, window_bounds = array<i64: 1, 1>}]} {
    %c0_i32 = arith.constant 0 : i32
    %0 = arith.cmpi eq, %arg0, %c0_i32 : i32
    %1 = arith.extui %0 : i1 to i32
    %c0_i32_0 = arith.constant 0 : i32
    %2 = arith.cmpi ne, %1, %c0_i32_0 : i32
    scf.if %2 {
      %cst_19 = arith.constant 0.000000e+00 : f32
      %42 = vector.broadcast %cst_19 : f32 to vector<1x1xf32>
      %c0_20 = arith.constant 0 : index
      %c0_21 = arith.constant 0 : index
      %43 = vector.load %arg5[%c0_20, %c0_21] : memref<1x1xf32, #tpu.memory_space<vmem>>, vector<1x1xf32>
      tpu.vector_store %arg5[%c0_20, %c0_21], %42 {strides = array<i32>} : memref<1x1xf32, #tpu.memory_space<vmem>>, vector<1x1xf32>,
    } else {
    }
    %c0 = arith.constant 0 : index
    %c0_1 = arith.constant 0 : index
    %3 = vector.load %arg1[%c0, %c0_1] : memref<8x32xf32, #tpu.memory_space<vmem>>, vector<8x32xf32>
    %c0_2 = arith.constant 0 : index
    %c0_3 = arith.constant 0 : index
    %4 = vector.load %arg2[%c0_2, %c0_3] : memref<8x32xf32, #tpu.memory_space<vmem>>, vector<8x32xf32>
    %c0_4 = arith.constant 0 : index
    %c0_5 = arith.constant 0 : index
    %5 = vector.load %arg3[%c0_4, %c0_5] : memref<8x1xf32, #tpu.memory_space<vmem>>, vector<8x1xf32>
    %6 = arith.subf %3, %4 : vector<8x32xf32>
    %cst = arith.constant 9.99999997E-7 : f32
    %7 = vector.broadcast %cst : f32 to vector<8x32xf32>
    %8 = arith.addf %6, %7 : vector<8x32xf32>
    %9 = arith.mulf %8, %8 : vector<8x32xf32>
    %cst_6 = arith.constant dense<0.000000e+00> : vector<8xf32>
    %10 = vector.multi_reduction <add>, %9, %cst_6 [1] : vector<8x32xf32> to vector<8xf32>
    %11 = vector.shape_cast %10 : vector<8xf32> to vector<8x1xf32>
    %12 = math.sqrt %11 : vector<8x1xf32>
    %cst_7 = arith.constant 2.000000e+00 : f32
    %13 = vector.broadcast %cst_7 : f32 to vector<8x1xf32>
    %14 = arith.subf %13, %12 : vector<8x1xf32>
    %cst_8 = arith.constant 0.000000e+00 : f32
    %15 = vector.broadcast %cst_8 : f32 to vector<8x1xf32>
    %16 = arith.maximumf %14, %15 : vector<8x1xf32>
    %cst_9 = arith.constant 1.000000e+00 : f32
    %17 = vector.broadcast %cst_9 : f32 to vector<8x1xf32>
    %18 = arith.subf %17, %5 : vector<8x1xf32>
    %19 = arith.mulf %18, %11 : vector<8x1xf32>
    %20 = arith.mulf %16, %16 : vector<8x1xf32>
    %21 = arith.mulf %5, %20 : vector<8x1xf32>
    %22 = arith.addf %19, %21 : vector<8x1xf32>
    %23 = tpu.iota {dimensions = array<i32: 0>} : vector<8x1xi32>
    %c8_i32 = arith.constant 8 : i32
    %24 = arith.muli %arg0, %c8_i32 : i32
    %25 = vector.broadcast %24 : i32 to vector<8x1xi32>
    %26 = arith.addi %23, %25 : vector<8x1xi32>
    %c8_i32_10 = arith.constant 8 : i32
    %27 = vector.broadcast %c8_i32_10 : i32 to vector<8x1xi32>
    %28 = arith.cmpi slt, %26, %27 : vector<8x1xi32>
    %cst_11 = arith.constant 0.000000e+00 : f32
    %29 = vector.broadcast %cst_11 : f32 to vector<8x1xf32>
    %30 = arith.select %28, %22, %29 : vector<8x1xi1>, vector<8x1xf32>
    %c0_12 = arith.constant 0 : index
    %c0_13 = arith.constant 0 : index
    %31 = vector.load %arg5[%c0_12, %c0_13] : memref<1x1xf32, #tpu.memory_space<vmem>>, vector<1x1xf32>
    %32 = vector.shape_cast %30 : vector<8x1xf32> to vector<1x8x1xf32>
    %cst_14 = arith.constant dense<0.000000e+00> : vector<1xf32>
    %33 = vector.multi_reduction <add>, %32, %cst_14 [1, 2] : vector<1x8x1xf32> to vector<1xf32>
    %34 = vector.shape_cast %33 : vector<1xf32> to vector<1x1x1xf32>
    %35 = vector.extract %34[0, 0, 0] : f32 from vector<1x1x1xf32>
    %36 = vector.broadcast %35 : f32 to vector<1x1xf32>
    %37 = arith.addf %31, %36 : vector<1x1xf32>
    %c0_15 = arith.constant 0 : index
    %c0_16 = arith.constant 0 : index
    %38 = vector.load %arg5[%c0_15, %c0_16] : memref<1x1xf32, #tpu.memory_space<vmem>>, vector<1x1xf32>
    tpu.vector_store %arg5[%c0_15, %c0_16], %37 {strides = array<i32>} : memref<1x1xf32, #tpu.memory_space<vmem>>, vector<1x1xf32>,
    %c0_i32_17 = arith.constant 0 : i32
    %39 = arith.cmpi eq, %arg0, %c0_i32_17 : i32
    %40 = arith.extui %39 : i1 to i32
    %c0_i32_18 = arith.constant 0 : i32
    %41 = arith.cmpi ne, %40, %c0_i32_18 : i32
    scf.if %41 {
      %c0_19 = arith.constant 0 : index
      %c0_20 = arith.constant 0 : index
      %42 = vector.load %arg5[%c0_19, %c0_20] : memref<1x1xf32, #tpu.memory_space<vmem>>, vector<1x1xf32>
      %cst_21 = arith.constant 8.000000e+00 : f32
      %43 = vector.broadcast %cst_21 : f32 to vector<1x1xf32>
      %44 = arith.divf %42, %43 : vector<1x1xf32>
      %c0_22 = arith.constant 0 : index
      %c0_23 = arith.constant 0 : index
      %45 = vector.load %arg4[%c0_22, %c0_23] : memref<1x1xf32, #tpu.memory_space<vmem>>, vector<1x1xf32>
      tpu.vector_store %arg4[%c0_22, %c0_23], %44 {strides = array<i32>} : memref<1x1xf32, #tpu.memory_space<vmem>>, vector<1x1xf32>,
    } else {
    }
    return
  }
  func.func @transform_0(%arg0: i32) -> (i32, i32) {
    %c0_i32 = arith.constant 0 : i32
    %c0_i32_0 = arith.constant 0 : i32
    return %arg0, %c0_i32 : i32, i32
  }
  func.func @transform_1(%arg0: i32) -> (i32, i32) {
    %c0_i32 = arith.constant 0 : i32
    %c0_i32_0 = arith.constant 0 : i32
    return %arg0, %c0_i32 : i32, i32
  }
  func.func @transform_2(%arg0: i32) -> (i32, i32) {
    %c0_i32 = arith.constant 0 : i32
    %c0_i32_0 = arith.constant 0 : i32
    return %arg0, %c0_i32 : i32, i32
  }
  func.func @transform_3(%arg0: i32) -> (i32, i32) {
    %c0_i32 = arith.constant 0 : i32
    %c0_i32_0 = arith.constant 0 : i32
    %c0_i32_1 = arith.constant 0 : i32
    return %c0_i32, %c0_i32_0 : i32, i32
  }
}

</mosaic_0001>

<bundles_post_ra>
// kernel: tpu_custom_call.1
= control target key start
LH: loop header
LB: loop body
LE: loop exit
PB: predicated region body
PF: predicated region fallthrough
CT: control target
= control target key end

     0   :  { %8 = vsyncpa [#allocation4], 0  ;;  %s191_s0 = inlined_call_operand.vmem [shape: f32[8,32], index: 0, kind: input, shape index: {}]   ;;  %s192_s1 = inlined_call_operand.hbm [shape: f32[8,32], index: 1, kind: input, shape index: {}]   ;;  %s193_s2 = inlined_call_operand.vmem [shape: f32[8,1], index: 2, kind: input, shape index: {}]   ;;  %s194_s3 = inlined_call_operand.hbm [shape: f32[1,1], index: 3, kind: output, shape index: {}]  }
   0x1   :  { %9 = vsyncpa [#allocation5], 0  ;;  %s153_s12 = smov [#allocation3]  }
   0x2   :  { %s18_s13 = sshll.u32 %s153_s12, 4  ;;  %s19_s13 = int_to_ptr.vmem [resolvable:$true] %s18_s13 }
   0x3   :  { %s117_s14 = scalar_lea.vmem %s19_s13, 128  ;;  %p122_p1 = scmp.lt.s32.totalorder %s19_s13, %s19_s13 }
   0x4   :  { %p118_p0 = scmp.ne.s32.totalorder %s19_s13, %s117_s14  ;;  %p123_p2 = scmp.lt.s32.totalorder %s117_s14, %s117_s14 }
   0x6   :  { %p124_p3 = por %p123_p2, %p122_p1 }
   0x8   :  { %p125_p4 = pnand %p124_p3, %p118_p0 }
   0xa   :  { %128 = shalt.err (!%p125_p4)
}
   0xb   :  { %21 = dma.hbm_to_vmem [thread:$0]  %s192_s1, 128, %s19_s13, [#allocation4]  }
   0xc   :  { %149 = dma.done.wait [#allocation4], 128  }
   0xd   :  { %150 = vsyncadd [#allocation4], 4294967168  ;;  %v33_v0 = vld [vmem:[%s191_s0] sm:$0xff]  ;;  %vm39_vm0 = vcmask 261120   ;;  %vm65_vm3 = vcmask 7168   ;;  %vm31_vm4 = vcmask 0  }
   0xe   :  { %v34_v1 = vld [vmem:[#allocation3] sm:$0xff]  ;;  %v154_v21 = vmov 0.0  }
   0xf   :  { %v36_v2 = vsub.f32 %v33_v0, %v34_v1  ;;  %v35_v11 = vld [vmem:[%s193_s2] sm:$0xff]  ;;  %32 = vst.msk [vmem:[#allocation2] sm:$0x1] %vm31_vm4, %v154_v21  ;;  %s155_s2 = smov [#allocation6]  }
  0x10   :  { %v52_v15 = vsub.f32 1.0, %v35_v11  ;;  %s93_s20 = sshll.u32 %s155_s2, 4  ;;  %s94_s20 = int_to_ptr.vmem [resolvable:$true] %s93_s20 }
  0x11   :  { %v37_v3 = vadd.f32 1e-06, %v36_v2  ;;  %s129_s21 = scalar_lea.vmem %s94_s20, 16  ;;  %s133_s22 = scalar_lea.vmem %s94_s20, 32 }
  0x12   :  { %p130_p5 = scmp.ne.s32.totalorder %s94_s20, %s129_s21  ;;  %p134_p6 = scmp.lt.s32.totalorder %s94_s20, %s94_s20 }
  0x13   :  { %v38_v4 = vmul.f32 %v37_v3, %v37_v3  ;;  %p135_p7 = scmp.lt.s32.totalorder %s133_s22, %s129_s21 }
  0x15   :  { %v40_v5 = vsel %vm39_vm0, %v38_v4, 0.0  ;;  %p136_p8 = por %p135_p7, %p134_p6 }
  0x16   :  { %41 = vadd.xlane.f32.xlu0 %v40_v5  ;;  %v64_v29 = vld [vmem:[#allocation2] sm:$0x1] }
  0x17   :  { %p137_p9 = pnand %p136_p8, %p130_p5 }
  0x9f   :  { %v42_v6 = vpop.xlane.xlu0 %41 }
  0xa0   :  { %107 = vrsqrt.f32 %v42_v6  ;;  %vm45_vm1 = vcmp.eq.f32.partialorder %v42_v6, inf  ;;  %v48_v9 = vand.u32 2147483648, %v42_v6  ;;  %vm47_vm2 = vcmp.eq.f32.partialorder %v42_v6, 0.0 }
  0xa1   :  { %v53_v17 = vmul.f32 %v52_v15, %v42_v6 }
  0xad   :  { %v108_v7 = vpop.eup %107 }
  0xae   :  { %v44_v8 = vmul.f32 %v108_v7, %v42_v6 }
  0xb0   :  { %v46_v10 = vsel %vm45_vm1, %v42_v6, %v44_v8 }
  0xb1   :  { %v49_v12 = vsel %vm47_vm2, %v48_v9, %v46_v10 }
  0xb2   :  { %v50_v13 = vsub.f32 2.0, %v49_v12 }
  0xb4   :  { %v51_v14 = vmax.f32 %v50_v13, 0.0 }
  0xb6   :  { %v54_v16 = vmul.f32 %v51_v14, %v51_v14 }
  0xb8   :  { %v55_v18 = vmul.f32 %v54_v16, %v35_v11 }
  0xba   :  { %v56_v19 = vadd.f32 %v55_v18, %v53_v17 }
  0xbc   :  { %v66_v20 = vsel %vm65_vm3, %v56_v19, 0.0 }
  0xbd   :  { %67 = vadd.xlane.f32.xlu0 %v66_v20 }
 0x146   :  { %v68_v22 = vpop.xlane.xlu0 %67 }
 0x147   :  { %v69_v23 = vrot.slane %v68_v22, 4 }
 0x149   :  { %v70_v24 = vadd.f32 %v69_v23, %v68_v22 }
 0x14b   :  { %v71_v25 = vrot.slane %v70_v24, 2 }
 0x14d   :  { %v72_v26 = vadd.f32 %v71_v25, %v70_v24 }
 0x14f   :  { %v73_v27 = vrot.slane %v72_v26, 1 }
 0x151   :  { %v74_v28 = vadd.f32 %v73_v27, %v72_v26 }
 0x153   :  { %102 = vpush %v74_v28 }
 0x184   :  { %s103_s0 = spop %102 }
 0x185   :  { %v76_v30 = vstv %s103_s0 }
 0x186   :  { %v77_v31 = vadd.f32 %v76_v30, %v64_v29 }
 0x188   :  { %79 = vst.msk [vmem:[#allocation2] sm:$0x1] %vm31_vm4, %v77_v31 }
 0x18f   :  { %v83_v32 = vld [vmem:[#allocation2] sm:$0x1] }
 0x190   :  { %v85_v33 = vmul.f32 0.125, %v83_v32 }
 0x192   :  { %86 = vst.msk [vmem:[#allocation6] sm:$0x1] %vm31_vm4, %v85_v33 }
 0x193   :  { %140 = shalt.err (!%p137_p9)
}
 0x194   :  { %96 = dma.vmem_to_hbm [thread:$0]  %s94_s20, 16, %s194_s3, [#allocation5]  }
 0x195   :  { %151 = dma.done.wait [#allocation5], 16  }
 0x196   :  { %152 = vsyncadd [#allocation5], 4294967280 }
 0x197   :  { %100 = vsyncpa [#allocation4], 1 }
 0x198   :  { %101 = vsyncpa [#allocation5], 1 }

</bundles_post_ra>
